<compile_context>
chip_gen: v6e
topology: v6e:2x2x1
jax: 0.10.0
libtpu: 0.0.40
codegen_flags: <defaults>
</compile_context>

<pallas_src>
import functools
import math

import jax
import jax.numpy as jnp
from jax.experimental import pallas as pl
from jax.experimental.pallas import tpu as pltpu


def _round_up(x, m):
    return ((x + m - 1) // m) * m


# ----------------------------------------------------------------------------
# Pallas kernels
# ----------------------------------------------------------------------------
def matmul_kernel(x_ref, w_ref, b_ref, o_ref, *, leaky):
    """Fused (im2col) matmul + bias + optional LeakyReLU(0.2), f32 accumulation."""
    acc = jnp.dot(x_ref[...], w_ref[...], preferred_element_type=jnp.float32)
    acc = acc + b_ref[...]
    if leaky:
        acc = jnp.where(acc >= 0.0, acc, 0.2 * acc)
    o_ref[...] = acc.astype(o_ref.dtype)


def groupnorm_kernel(x_ref, m_ref, mt_ref, o_ref, *, eps, leaky, inv_count):
    """Unscaled GroupNorm (+ fused LeakyReLU) for one batch element in NHWC.

    x_ref: (1, H*W, C); group stats are computed in ONE pass (E[x^2]-mean^2)
    with per-group reduce/broadcast done via tiny 0/1 mask matmuls so no
    transposes or lane-splitting reshapes are needed.
    """
    x = x_ref[0].astype(jnp.float32)                       # (S, C)
    s1 = jnp.sum(x, axis=0, keepdims=True)                 # (1, C)
    s2 = jnp.sum(x * x, axis=0, keepdims=True)             # (1, C)
    gs1 = jnp.dot(s1, m_ref[...], preferred_element_type=jnp.float32)   # (1, G)
    gs2 = jnp.dot(s2, m_ref[...], preferred_element_type=jnp.float32)   # (1, G)
    mean_g = gs1 * inv_count
    var_g = gs2 * inv_count - mean_g * mean_g
    rstd_g = jax.lax.rsqrt(var_g + eps)
    mean_c = jnp.dot(mean_g, mt_ref[...], preferred_element_type=jnp.float32)  # (1, C)
    rstd_c = jnp.dot(rstd_g, mt_ref[...], preferred_element_type=jnp.float32)  # (1, C)
    y = (x - mean_c) * rstd_c
    if leaky:
        y = jnp.where(y >= 0.0, y, 0.2 * y)
    o_ref[0] = y.astype(o_ref.dtype)


def attn_kernel(q_ref, kT_ref, v_ref, x_ref, we_ref, o_ref, *, dk):
    """Additive attention over spatial positions, one batch element per step.

    score[i, j] = sum_d we[d] * tanh(q[i, d] + k[j, d]); softmax over j;
    out = x + softmax(score) @ v   (residual add).
    """
    # TODO(synk): switch to flash-style key tiling (online softmax) if S grows
    # enough that the (S, S) f32 score matrix no longer fits VMEM (v7x: 64 MiB).
    q = q_ref[...][0]                       # (S, dk)  f32
    kT = kT_ref[...][0]                     # (dk, S)  f32
    v = v_ref[...][0]                       # (S, C)   f32
    x = x_ref[...][0].astype(jnp.float32)   # (S, C)
    S = q.shape[0]
    s = jnp.zeros((S, S), jnp.float32)
    for d in range(dk):                     # dk is tiny and static
        s = s + we_ref[d] * jnp.tanh(q[:, d:d + 1] + kT[d:d + 1, :])
    s = s - jnp.max(s, axis=-1, keepdims=True)
    p = jnp.exp(s)
    p = p * pl.reciprocal(jnp.sum(p, axis=-1, keepdims=True), approx=True)
    o = jnp.dot(p, v, preferred_element_type=jnp.float32)
    o_ref[0] = (x + o).astype(o_ref.dtype)


# ----------------------------------------------------------------------------
# Pallas wrappers
# ----------------------------------------------------------------------------
def pallas_matmul(x, w_pad, b_pad, n_out, *, leaky=False,
                  out_dtype=jnp.bfloat16, tm=256):
    """x: (M, K); w_pad: (K, Npad) bf16 with Npad % 128 == 0 (zero-padded
    columns); b_pad: (1, Npad) f32. Returns (M, n_out) in out_dtype."""
    M, K = x.shape
    Kw, Npad = w_pad.shape
    assert Kw == K and Npad % 128 == 0

    tm_eff = min(tm, _round_up(M, 8))
    Mpad = _round_up(M, tm_eff)
    xp = x.astype(jnp.bfloat16)
    if Mpad != M:
        xp = jnp.pad(xp, ((0, Mpad - M), (0, 0)))

    cost = pl.CostEstimate(
        flops=2 * Mpad * K * Npad,
        transcendentals=0,
        bytes_accessed=(Mpad * K * 2 + K * Npad * 2 + Npad * 4
                        + Mpad * Npad * jnp.dtype(out_dtype).itemsize),
    )
    out = pl.pallas_call(
        functools.partial(matmul_kernel, leaky=leaky),
        out_shape=jax.ShapeDtypeStruct((Mpad, Npad), out_dtype),
        grid=(Mpad // tm_eff,),
        in_specs=[
            pl.BlockSpec((tm_eff, K), lambda i: (i, 0)),
            pl.BlockSpec((K, Npad), lambda i: (0, 0)),
            pl.BlockSpec((1, Npad), lambda i: (0, 0)),
        ],
        out_specs=pl.BlockSpec((tm_eff, Npad), lambda i: (i, 0)),
        compiler_params=pltpu.CompilerParams(
            dimension_semantics=("parallel",)),
        cost_estimate=cost,
    )(xp, w_pad, b_pad)
    return out[:M, :n_out]


def pallas_groupnorm(x_nhwc, groups, *, eps=1e-5, leaky=False,
                     out_dtype=jnp.bfloat16):
    N, H, W, C = x_nhwc.shape
    cg = C // groups
    S = H * W
    x2 = x_nhwc.reshape(N, S, C)   # free view (contiguous), no transpose glue
    gid = jnp.arange(C) // cg
    m = (gid[:, None] == jnp.arange(groups)[None, :]).astype(jnp.float32)  # (C, G)
    mt = jnp.transpose(m)                                                  # (G, C)
    cost = pl.CostEstimate(
        flops=10 * N * S * C,
        transcendentals=N * groups,
        bytes_accessed=N * S * C * (x2.dtype.itemsize
                                    + jnp.dtype(out_dtype).itemsize),
    )
    y = pl.pallas_call(
        functools.partial(groupnorm_kernel, eps=eps, leaky=leaky,
                          inv_count=1.0 / (S * cg)),
        out_shape=jax.ShapeDtypeStruct((N, S, C), out_dtype),
        grid=(N,),
        in_specs=[
            pl.BlockSpec((1, S, C), lambda n: (n, 0, 0)),
            pl.BlockSpec((C, groups), lambda n: (0, 0)),
            pl.BlockSpec((groups, C), lambda n: (0, 0)),
        ],
        out_specs=pl.BlockSpec((1, S, C), lambda n: (n, 0, 0)),
        compiler_params=pltpu.CompilerParams(
            dimension_semantics=("parallel",)),
        cost_estimate=cost,
    )(x2, m, mt)
    return y.reshape(N, H, W, C)


def pallas_additive_attention(x_nhwc, qkv_prm, we, dk, *, out_dtype=jnp.bfloat16):
    # TODO(synk): reference AdditiveMultiheadAttention2d source unavailable;
    # implemented as 1-head additive (tanh) attention with residual add,
    # normalize=False -> no extra output normalization.
    N, H, W, C = x_nhwc.shape
    S = H * W
    xf = x_nhwc.reshape(N * S, C)
    # Fused q|k|v projection: one lane-dense matmul, activation read once.
    qkv = pallas_matmul(xf, qkv_prm["w"], qkv_prm["b"], qkv_prm["n"],
                        out_dtype=jnp.float32)
    q = qkv[:, :dk].reshape(N, S, dk)
    k = qkv[:, dk:2 * dk].reshape(N, S, dk)
    v = qkv[:, 2 * dk:2 * dk + C].reshape(N, S, C)
    # Transpose only the tiny (N, S, dk) projection (dk = 2*nf//8), not the
    # activation tensor, so the HBM cost is negligible.
    kT = jnp.transpose(k, (0, 2, 1))
    x3 = x_nhwc.reshape(N, S, C)
    cost = pl.CostEstimate(
        flops=N * (3 * dk * S * S + 4 * S * S * C),
        transcendentals=N * (dk + 1) * S * S,
        bytes_accessed=N * S * ((2 * dk + S + 2 * C) * 4 + 2 * C * 2),
    )
    y = pl.pallas_call(
        functools.partial(attn_kernel, dk=dk),
        out_shape=jax.ShapeDtypeStruct((N, S, C), out_dtype),
        grid=(N,),
        in_specs=[
            pl.BlockSpec((1, S, dk), lambda n: (n, 0, 0)),
            pl.BlockSpec((1, dk, S), lambda n: (n, 0, 0)),
            pl.BlockSpec((1, S, C), lambda n: (n, 0, 0)),
            pl.BlockSpec((1, S, C), lambda n: (n, 0, 0)),
            pl.BlockSpec(memory_space=pltpu.SMEM),
        ],
        out_specs=pl.BlockSpec((1, S, C), lambda n: (n, 0, 0)),
        compiler_params=pltpu.CompilerParams(
            dimension_semantics=("parallel",)),
        cost_estimate=cost,
    )(q, kT, v, x3, we.astype(jnp.float32))
    return y.reshape(N, H, W, C)


# ----------------------------------------------------------------------------
# Glue: im2col (pure slicing, no compute) and parameter setup
# ----------------------------------------------------------------------------
def im2col(x_nhwc, kh, kw, stride, pad):
    # TODO(synk): overlapping conv windows aren't expressible with block-index
    # BlockSpec maps, so patches are still materialized here in XLA; the bf16
    # activation path halves that traffic.
    x = jnp.pad(x_nhwc, ((0, 0), (pad, pad), (pad, pad), (0, 0)))
    N, H, W, C = x.shape
    oh = (H - kh) // stride + 1
    ow = (W - kw) // stride + 1
    cols = []
    for i in range(kh):
        for j in range(kw):
            cols.append(x[:, i:i + stride * oh:stride, j:j + stride * ow:stride, :])
    patches = jnp.stack(cols, axis=-2)                 # (N, oh, ow, kh*kw, C)
    return patches.reshape(N * oh * ow, kh * kw * C), (N, oh, ow)


def kaiming_uniform(key, shape, fan_in):
    # nn.init.kaiming_uniform_(w, a=1): gain = sqrt(2/(1+1)) = 1
    bound = math.sqrt(3.0 / fan_in)
    return jax.random.uniform(key, shape, jnp.float32, -bound, bound)


def spectral_normalize(w, iters=30):
    """Divide by largest singular value of w.reshape(out, -1) (power iteration)."""
    out = w.shape[0]
    w2d = w.reshape(out, -1)
    u = jnp.ones((out,), jnp.float32) / math.sqrt(out)
    v = None
    for _ in range(iters):
        v = w2d.T @ u
        v = v / (jnp.linalg.norm(v) + 1e-12)
        u = w2d @ v
        u = u / (jnp.linalg.norm(u) + 1e-12)
    sigma = u @ (w2d @ v)
    return w / sigma


def conv_w_to_matmul(w):
    """PyTorch conv weight (Cout, Cin, KH, KW) -> (KH*KW*Cin, Cout)."""
    cout = w.shape[0]
    return jnp.transpose(w, (2, 3, 1, 0)).reshape(-1, cout)


def _prep_matmul_params(w2d, bias=None):
    """(K, N) f32 weight -> lane-dense bf16 (K, Npad) + f32 (1, Npad) bias."""
    K, N = w2d.shape
    Npad = _round_up(max(N, 128), 128)
    wp = jnp.pad(w2d, ((0, 0), (0, Npad - N))).astype(jnp.bfloat16)
    b = jnp.zeros((N,), jnp.float32) if bias is None else bias.astype(jnp.float32)
    bp = jnp.pad(b, (0, Npad - N)).reshape(1, Npad)
    return {"w": wp, "b": bp, "n": N}


def make_params(key, nc, nf):
    ks = jax.random.split(key, 9)
    c2, c4 = nf * 2, nf * 4
    dk = c2 // 8
    w1 = spectral_normalize(kaiming_uniform(ks[0], (nf, nc, 4, 4), nc * 16))
    w2 = spectral_normalize(kaiming_uniform(ks[1], (c2, nf, 4, 4), nf * 16))
    w3 = spectral_normalize(kaiming_uniform(ks[2], (c4, c2, 4, 4), c2 * 16))
    w4 = spectral_normalize(kaiming_uniform(ks[3], (1, c4, 4, 4), c4 * 16))
    wq = kaiming_uniform(ks[4], (c2, dk), c2)
    wk = kaiming_uniform(ks[5], (c2, dk), c2)
    wv = kaiming_uniform(ks[6], (c2, c2), c2)
    wqkv = jnp.concatenate([wq, wk, wv], axis=1)        # fused q|k|v projection
    return {
        "c1": _prep_matmul_params(conv_w_to_matmul(w1), jnp.zeros((nf,), jnp.float32)),
        "c2": _prep_matmul_params(conv_w_to_matmul(w2)),
        "c3": _prep_matmul_params(conv_w_to_matmul(w3)),
        "c4": _prep_matmul_params(conv_w_to_matmul(w4)),
        "qkv": _prep_matmul_params(wqkv),
        "we": kaiming_uniform(ks[7], (dk,), dk),
        "dk": dk,
    }


def gan_d_forward(x_nchw, params, nf):
    ng = 2

    def conv(p, prm, leaky=False, out_dtype=jnp.bfloat16):
        return pallas_matmul(p, prm["w"], prm["b"], prm["n"],
                             leaky=leaky, out_dtype=out_dtype)

    x = jnp.transpose(x_nchw, (0, 2, 3, 1)).astype(jnp.bfloat16)  # NCHW -> NHWC

    # Conv2d(nc, nf, 4, 2, 1) + LeakyReLU(0.2)   [bias, spectral-normed]
    p, (n, oh, ow) = im2col(x, 4, 4, 2, 1)
    y = conv(p, params["c1"], leaky=True).reshape(n, oh, ow, -1)

    # Conv2d(nf, 2nf, 4, 2, 1, bias=False)
    p, (n, oh, ow) = im2col(y, 4, 4, 2, 1)
    y = conv(p, params["c2"]).reshape(n, oh, ow, -1)

    # GroupNormUnscaled(2*ng, 2nf) + LeakyReLU(0.2)
    y = pallas_groupnorm(y, groups=2 * ng, leaky=True)

    # AdditiveMultiheadAttention2d(2nf, 1 head, 2nf//8, normalize=False)
    y = pallas_additive_attention(y, params["qkv"], params["we"], params["dk"])

    # Conv2d(2nf, 4nf, 4, 2, 1, bias=False)
    p, (n, oh, ow) = im2col(y, 4, 4, 2, 1)
    y = conv(p, params["c3"]).reshape(n, oh, ow, -1)

    # GroupNormUnscaled(4*ng, 4nf) + LeakyReLU(0.2)
    y = pallas_groupnorm(y, groups=4 * ng, leaky=True)

    # Conv2d(4nf, 1, 4, 1, 0, bias=False) -- N=1 stays inside the padded
    # 128-wide matmul (zero weight columns) and is sliced afterwards.
    p, (n, oh, ow) = im2col(y, 4, 4, 1, 0)
    y = conv(p, params["c4"], out_dtype=jnp.float32).reshape(n, oh, ow, -1)

    return y.reshape(-1)   # .view(-1)


if __name__ == "__main__":
    key = jax.random.PRNGKey(0)
    k_in, k_par = jax.random.split(key)

    batch, nc, nf, spatial = 2, 3, 8, 32
    x = jax.random.normal(k_in, (batch, nc, spatial, spatial), jnp.float32)
    params = make_params(k_par, nc, nf)

    out = gan_d_forward(x, params, nf)
    out = jax.block_until_ready(out)
    assert out.shape == (batch,), out.shape
    assert jnp.all(jnp.isfinite(out))
    print("KERNEL_OK")
</pallas_src>

<mosaic_0001>
module attributes {stable_mosaic.version = 11 : i64} {
  func.func @matmul_kernel(%arg0: i32, %arg1: memref<256x48xbf16, #tpu.memory_space<vmem>>, %arg2: memref<48x128xbf16, #tpu.memory_space<vmem>>, %arg3: memref<1x128xf32, #tpu.memory_space<vmem>>, %arg4: memref<256x128xbf16, #tpu.memory_space<vmem>>) attributes {dimension_semantics = [#tpu.dimension_semantics<parallel>], iteration_bounds = array<i64: 2>, scalar_prefetch = 0 : i64, scratch_operands = 0 : i64, tpu.core_type = #tpu.core_type<tc>, window_params = [{transform_indices = @transform_0, window_bounds = array<i64: 256, 48>}, {pipeline_mode = #tpu.pipeline_mode<synchronous>, transform_indices = @transform_1, window_bounds = array<i64: 48, 128>}, {pipeline_mode = #tpu.pipeline_mode<synchronous>, transform_indices = @transform_2, window_bounds = array<i64: 1, 128>}, {transform_indices = @transform_3, window_bounds = array<i64: 256, 128>}]} {
    %c0 = arith.constant 0 : index
    %c0_0 = arith.constant 0 : index
    %0 = vector.load %arg1[%c0, %c0_0] : memref<256x48xbf16, #tpu.memory_space<vmem>>, vector<256x48xbf16>
    %c0_1 = arith.constant 0 : index
    %c0_2 = arith.constant 0 : index
    %1 = vector.load %arg2[%c0_1, %c0_2] : memref<48x128xbf16, #tpu.memory_space<vmem>>, vector<48x128xbf16>
    %cst = arith.constant dense<0.000000e+00> : vector<256x128xf32>
    %2 = tpu.matmul %0, %1, %cst {dimension_numbers = #tpu.dot_dimension_numbers<[1], [0], [0], [1], [0, 0, 1, 1], [], []>} : vector<256x48xbf16>, vector<48x128xbf16>, vector<256x128xf32> -> vector<256x128xf32>
    %c0_3 = arith.constant 0 : index
    %c0_4 = arith.constant 0 : index
    %3 = vector.load %arg3[%c0_3, %c0_4] : memref<1x128xf32, #tpu.memory_space<vmem>>, vector<1x128xf32>
    %4 = vector.broadcast %3 : vector<1x128xf32> to vector<256x128xf32>
    %5 = arith.addf %2, %4 : vector<256x128xf32>
    %cst_5 = arith.constant 0.000000e+00 : f32
    %6 = vector.broadcast %cst_5 : f32 to vector<256x128xf32>
    %7 = arith.cmpf oge, %5, %6 : vector<256x128xf32>
    %cst_6 = arith.constant 2.000000e-01 : f32
    %8 = vector.broadcast %cst_6 : f32 to vector<256x128xf32>
    %9 = arith.mulf %8, %5 : vector<256x128xf32>
    %10 = arith.select %7, %5, %9 : vector<256x128xi1>, vector<256x128xf32>
    %11 = arith.truncf %10 : vector<256x128xf32> to vector<256x128xbf16>
    %c0_7 = arith.constant 0 : index
    %c0_8 = arith.constant 0 : index
    %12 = vector.load %arg4[%c0_7, %c0_8] : memref<256x128xbf16, #tpu.memory_space<vmem>>, vector<256x128xbf16>
    tpu.vector_store %arg4[%c0_7, %c0_8], %11 {strides = array<i32>} : memref<256x128xbf16, #tpu.memory_space<vmem>>, vector<256x128xbf16>,
    return
  }
  func.func @transform_0(%arg0: i32) -> (i32, i32) {
    %c0_i32 = arith.constant 0 : i32
    %c0_i32_0 = arith.constant 0 : i32
    return %arg0, %c0_i32 : i32, i32
  }
  func.func @transform_1(%arg0: i32) -> (i32, i32) {
    %c0_i32 = arith.constant 0 : i32
    %c0_i32_0 = arith.constant 0 : i32
    %c0_i32_1 = arith.constant 0 : i32
    return %c0_i32, %c0_i32_0 : i32, i32
  }
  func.func @transform_2(%arg0: i32) -> (i32, i32) {
    %c0_i32 = arith.constant 0 : i32
    %c0_i32_0 = arith.constant 0 : i32
    %c0_i32_1 = arith.constant 0 : i32
    return %c0_i32, %c0_i32_0 : i32, i32
  }
  func.func @transform_3(%arg0: i32) -> (i32, i32) {
    %c0_i32 = arith.constant 0 : i32
    %c0_i32_0 = arith.constant 0 : i32
    return %arg0, %c0_i32 : i32, i32
  }
}

</mosaic_0001>

<bundles_post_ra>
// kernel: tpu_custom_call.1
= control target key start
LH: loop header
LB: loop body
LE: loop exit
PB: predicated region body
PF: predicated region fallthrough
CT: control target
= control target key end

     0   :  { %8 = vsyncpa [#allocation3], 0  ;;  %s1483_s0 = inlined_call_operand.vmem [shape: bf16[512,48], index: 0, kind: input, shape index: {}]   ;;  %s1484_s1 = inlined_call_operand.vmem [shape: bf16[48,128], index: 1, kind: input, shape index: {}]   ;;  %s1485_s2 = inlined_call_operand.vmem [shape: f32[1,128], index: 2, kind: input, shape index: {}]   ;;  %s1486_s3 = inlined_call_operand.hbm [shape: bf16[512,128], index: 3, kind: output, shape index: {}]  }
   0x1   :  { %10 = vsyncpa [#allocation3 + $0x1], 0  ;;  %s1274_s12 = smov 0   ;;  %s1276_s13 = smov 0  }
   0x2   :  { %s1278_s14 = smov 0   ;;  %s1280_s15 = smov 0  }
   0x3 LB: > { %s1295_s16 = sadd.s32 4294967295, %s1249_s15   ;;  %s858_s17 = sadd.s32 4294967294, %s1249_s15   ;;  %s1249_s15 = sphi %s1280_s15, %s1492_s15   ;;  %s1245_s14 = sphi %s1278_s14, %s1491_s14   ;;  %s1241_s13 = sphi %s1276_s13, %s1490_s13   ;;  %s1237_s12 = sphi %s1274_s12, %s1489_s12  }
   0x4   : > { %s1299_s18 = sadd.s32 1, %s1249_s15   ;;  %s91_s19 = sadd.s32 1, %s1245_s14 }
   0x5   : > { %s88_s20 = ssub.s32 %s1249_s15, %s1299_s18  ;;  %p101_p0 = scmp.ne.s32.totalorder %s1245_s14, %s1241_s13 }
   0x6   : > { %p89_p1 = scmp.eq.s32.totalorder %s88_s20, 0  ;;  %p102_p2 = scmp.eq.s32.totalorder %s1295_s16, 1 }
   0x7   : > { %p107_p3 = scmp.ne.s32.totalorder %s1241_s13, %s1237_s12  ;;  %p108_p4 = scmp.eq.s32.totalorder %s858_s17, 1 }
   0x8   : > { %s1310_s21 = scalar_select %p89_p1, %s1245_s14, %s91_s19  }
   0x9   : > { %p1312_p5 = por %p102_p2, %p101_p0  ;;  %p1316_p6 = por %p108_p4, %p107_p3 }
   0xa   : > { %p861_p7 = scmp.ge.s32.totalorder %s1249_s15, 1  ;;  %p141_p8 = scmp.lt.s32.totalorder %s1249_s15, 3 }
   0xc   : > { %p142_p9 = pnand %p861_p7, %p141_p8 }
   0xd   : > { %s863_s26 = sshll.u32 (!%p142_p9), %s1295_s16, 5  ;;  %s162_s10 = sand.u32 (!%p142_p9), 1, %s1241_s13  }
   0xe   : > { %145 = sbr.rel (%p142_p9) target bundleno = 280 (0x118), region = 32  ;;  %p166_p10 = scmp.lt.s32.totalorder (!%p142_p9), %s863_s26, 63 }
   0xf   : > { %s862_s11 = sshll.u32 (!%p142_p9), %s162_s10, 7  ;;  %s970_s19 = sshll.u32 (!%p142_p9), %s1295_s16, 11 }
  0x10   : > { %s1388_s17 = scalar_lea.vmem (!%p142_p9), [#allocation2], %s862_s11  ;;  %s1443_s16 = scalar_lea.sflag (!%p142_p9), [#allocation3], %s162_s10 }
  0x11   : > { %s796_s20 = sshll.u32 (!%p142_p9), %s1388_s17, 4  ;;  %s1251_s28 = smov (!%p142_p9), [#allocation2]   ;;  %s1437_s20 = int_to_ptr.vmem [resolvable:$true] %s796_s20 }
  0x12   : > { %s1189_s27 = scalar_lea.vmem (!%p142_p9), %s1437_s20, 2048  ;;  %s1193_s29 = sshll.u32 (!%p142_p9), %s1251_s28, 4  ;;  %s1194_s29 = int_to_ptr.vmem [resolvable:$false] %s1193_s29 }
  0x13   : > { %v1170_v0 = vld [vmem:[%s1484_s1 + $0x10] sm:$0xff]   ;;  %v1171_v1 = vld [vmem:[%s1484_s1 + $0x8] sm:$0xff]   ;;  %s1494_s26 = smov (!%p166_p10, %s863_s26), 63  ;;  %v1172_v2 = vld [vmem:[%s1484_s1] sm:$0xff]   ;;  %vm316_vm0 = vcmask 392192   ;;  %p1190_p11 = scmp.ne.s32.totalorder %s1437_s20, %s1189_s27 }
  0x14   : > { %1085 = vmatprep.subr.bf16.mxu0 %v1170_v0  ;;  %1123 = vmatprep.subr.bf16.mxu1 %v1170_v0  ;;  %s864_s4 = sshll.u32 %s1494_s26, 2  ;;  %v1372_v19 = vld [vmem:[%s1485_s2] ss:$0 sm:$0xff]  ;;  %s1435_s26 = scalar_lea.hbm %s1486_s3, %s970_s19 }
  0x15   : > { %1086 = vmatpush3.bf16.msra.mxu0 %v1170_v0  ;;  %1126 = vmatpush3.bf16.msra.mxu1 %v1170_v0  ;;  %s1335_s7 = scalar_lea.vmem %s1483_s0, %s864_s4  ;;  %p1191_p12 = pnand %p1190_p11, %p1312_p5 }
  0x16   : > { %1087 = vmatprep.subr.bf16.mxu0 %v1171_v1  ;;  %1124 = vmatprep.subr.bf16.mxu1 %v1171_v1  ;;  %v1173_v3 = vld [vmem:[%s1335_s7] sm:$0xff]   ;;  %v1175_v5 = vld [vmem:[%s1335_s7 + $0x8] sm:$0xff]   ;;  %v1177_v7 = vld [vmem:[%s1335_s7 + $0x10] sm:$0xff]   ;;  %s1195_s30 = scalar_lea.vmem %s1194_s29, 4096  ;;  %p1196_p0 = scmp.lt.s32.totalorder %s1437_s20, %s1194_s29 }
  0x17   : > { %v1174_v4 = vld [vmem:[%s1335_s7 + $0x40] sm:$0xff]   ;;  %1091 = vmatprep.mubr.msk.bf16.mxu0 %vm316_vm0, %v1173_v3  ;;  %v1176_v6 = vld [vmem:[%s1335_s7 + $0x48] sm:$0xff]   ;;  %v1178_v8 = vld [vmem:[%s1335_s7 + $0x50] sm:$0xff]   ;;  %p1192_p13 = pneg %p1191_p12  ;;  %p1197_p1 = scmp.lt.s32.totalorder %s1195_s30, %s1189_s27 }
  0x18   : > { %1107 = vmatprep.mubr.msk.bf16.mxu1 %vm316_vm0, %v1174_v4  ;;  %v1179_v9 = vld [vmem:[%s1335_s7 + $0x18] sm:$0xff]   ;;  %v1181_v11 = vld [vmem:[%s1335_s7 + $0x20] sm:$0xff]   ;;  %v1183_v13 = vld [vmem:[%s1335_s7 + $0x28] sm:$0xff]  }
  0x19   : > { %1088 = vmatpush3.bf16.msra.mxu0 %v1171_v1  ;;  %1127 = vmatpush3.bf16.msra.mxu1 %v1171_v1  ;;  %v1180_v10 = vld [vmem:[%s1335_s7 + $0x58] sm:$0xff]   ;;  %v1182_v12 = vld [vmem:[%s1335_s7 + $0x60] sm:$0xff]   ;;  %v1184_v14 = vld [vmem:[%s1335_s7 + $0x68] sm:$0xff]   ;;  %p1198_p2 = por %p1197_p1, %p1196_p0 }
  0x1a   : > { %1089 = vmatprep.subr.bf16.mxu0 %v1172_v2  ;;  %1125 = vmatprep.subr.bf16.mxu1 %v1172_v2  ;;  %v1185_v15 = vld [vmem:[%s1335_s7 + $0x30] sm:$0xff]   ;;  %v1187_v17 = vld [vmem:[%s1335_s7 + $0x38] sm:$0xff]  }
  0x1b   : > { %v1186_v16 = vld [vmem:[%s1335_s7 + $0x70] sm:$0xff]   ;;  %v1188_v18 = vld [vmem:[%s1335_s7 + $0x78] sm:$0xff]   ;;  %p1199_p3 = pnand %p1198_p2, %p1192_p13 }
  0x1d   : > { %1090 = vmatpush3.bf16.msra.mxu0 %v1172_v2  ;;  %1128 = vmatpush3.bf16.msra.mxu1 %v1172_v2 }
  0x20   : > { %1092 = vmatmul.mubr.msk.bf16.vlgmr.msra.gmra.mxu0 %vm316_vm0, %v1175_v5  ;;  %1108 = vmatmul.mubr.msk.bf16.vlgmr.msra.gmra.mxu1 %vm316_vm0, %v1176_v6 }
  0x21   : > { %1095 = vmatprep.mubr.msk.bf16.mxu0 %vm316_vm0, %v1177_v7  ;;  %1111 = vmatprep.mubr.msk.bf16.mxu1 %vm316_vm0, %v1178_v8 }
  0x28   : > { %1096 = vmatmul.mubr.msk.bf16.gmra.mxu0 %vm316_vm0, %v1179_v9  ;;  %1112 = vmatmul.mubr.msk.bf16.gmra.mxu1 %vm316_vm0, %v1180_v10 }
  0x29   : > { %1099 = vmatprep.mubr.msk.bf16.mxu0 %vm316_vm0, %v1181_v11  ;;  %1115 = vmatprep.mubr.msk.bf16.mxu1 %vm316_vm0, %v1182_v12 }
  0x30   : > { %1100 = vmatmul.mubr.msk.bf16.gmra.mxu0 %vm316_vm0, %v1183_v13  ;;  %1116 = vmatmul.mubr.msk.bf16.gmra.mxu1 %vm316_vm0, %v1184_v14 }
  0x31   : > { %1103 = vmatprep.mubr.msk.bf16.mxu0 %vm316_vm0, %v1185_v15  ;;  %1119 = vmatprep.mubr.msk.bf16.mxu1 %vm316_vm0, %v1186_v16 }
  0x38   : > { %1104 = vmatmul.mubr.msk.bf16.gmra.mxu0 %vm316_vm0, %v1187_v17  ;;  %1120 = vmatmul.mubr.msk.bf16.gmra.mxu1 %vm316_vm0, %v1188_v18 }
  0xe0   : > { %v1093_v20 = vpop.f32.mrf.mxu0  ;;  %v1109_v21 = vpop.f32.mrf.mxu1 }
  0xe1   : > { %v408_v22 = vadd.f32 %v1093_v20, %v1372_v19  ;;  %v472_v23 = vadd.f32 %v1109_v21, %v1372_v19 }
  0xe2   : > { %v399_v24 = vpop.f32.mrf.mxu0  ;;  %v463_v25 = vpop.f32.mrf.mxu1 }
  0xe3   : > { %vm528_vm1 = vcmp.ge.f32.partialorder %v408_v22, 0.0  ;;  %v560_v26 = vmul.f32 0.2, %v408_v22  ;;  %vm544_vm2 = vcmp.ge.f32.partialorder %v472_v23, 0.0  ;;  %v576_v27 = vmul.f32 0.2, %v472_v23 }
  0xe4   : > { %v400_v28 = vadd.f32 %v1372_v19, %v399_v24  ;;  %v464_v29 = vadd.f32 %v1372_v19, %v463_v25  ;;  %v1094_v30 = vpop.f32.mrf.mxu0  ;;  %v1110_v31 = vpop.f32.mrf.mxu1 }
  0xe5   : > { %v592_v32 = vsel %vm528_vm1, %v408_v22, %v560_v26  ;;  %v411_v33 = vadd.f32 %v1094_v30, %v1372_v19  ;;  %v475_v34 = vadd.f32 %v1110_v31, %v1372_v19  ;;  %v608_v35 = vsel %vm544_vm2, %v472_v23, %v576_v27 }
  0xe6   : > { %vm526_vm3 = vcmp.ge.f32.partialorder %v400_v28, 0.0  ;;  %v558_v36 = vmul.f32 0.2, %v400_v28  ;;  %vm542_vm4 = vcmp.ge.f32.partialorder %v464_v29, 0.0  ;;  %v402_v37 = vpop.f32.mrf.mxu0  ;;  %v466_v38 = vpop.f32.mrf.mxu1  ;;  %v574_v42 = vmul.f32 0.2, %v464_v29 }
  0xe7   : > { %vm529_vm5 = vcmp.ge.f32.partialorder %v411_v33, 0.0  ;;  %v561_v39 = vmul.f32 0.2, %v411_v33  ;;  %vm545_vm6 = vcmp.ge.f32.partialorder %v475_v34, 0.0  ;;  %v577_v40 = vmul.f32 0.2, %v475_v34 }
  0xe8   : > { %v590_v41 = vsel %vm526_vm3, %v400_v28, %v558_v36  ;;  %v403_v43 = vadd.f32 %v1372_v19, %v402_v37  ;;  %v467_v44 = vadd.f32 %v1372_v19, %v466_v38  ;;  %v1097_v45 = vpop.f32.mrf.mxu0  ;;  %v1113_v46 = vpop.f32.mrf.mxu1  ;;  %v606_v58 = vsel %vm542_vm4, %v464_v29, %v574_v42 }
  0xe9   : > { %v593_v47 = vsel %vm529_vm5, %v411_v33, %v561_v39  ;;  %v609_v48 = vsel %vm545_vm6, %v475_v34, %v577_v40  ;;  %v424_v49 = vadd.f32 %v1097_v45, %v1372_v19  ;;  %v488_v50 = vadd.f32 %v1113_v46, %v1372_v19 }
  0xea   : > { %v979_v51 = vpack.c.bf16 %v593_v47, %v592_v32  ;;  %v1019_v52 = vpack.c.bf16 %v609_v48, %v608_v35  ;;  %vm527_vm7 = vcmp.ge.f32.partialorder %v403_v43, 0.0  ;;  %v559_v53 = vmul.f32 0.2, %v403_v43  ;;  %v415_v54 = vpop.f32.mrf.mxu0  ;;  %v479_v55 = vpop.f32.mrf.mxu1 }
  0xeb   : > { %vm543_vm8 = vcmp.ge.f32.partialorder %v467_v44, 0.0  ;;  %v575_v56 = vmul.f32 0.2, %v467_v44  ;;  %vm532_vm9 = vcmp.ge.f32.partialorder %v424_v49, 0.0  ;;  %v564_v57 = vmul.f32 0.2, %v424_v49 }
  0xec   : > { %1051 = vst [vmem:[%s1388_s17 + $0x8] sm:$0xff] %v979_v51   ;;  %1059 = vst [vmem:[%s1388_s17 + $0x48] sm:$0xff] %v1019_v52   ;;  %v591_v59 = vsel %vm527_vm7, %v403_v43, %v559_v53  ;;  %v580_v60 = vmul.f32 0.2, %v488_v50  ;;  %v416_v61 = vadd.f32 %v1372_v19, %v415_v54  ;;  %v1098_v62 = vpop.f32.mrf.mxu0  ;;  %v1114_v63 = vpop.f32.mrf.mxu1  ;;  %vm548_vm10 = vcmp.ge.f32.partialorder %v488_v50, 0.0 }
  0xed   : > { %v974_v0 = vpack.c.bf16 %v591_v59, %v590_v41  ;;  %v607_v1 = vsel %vm543_vm8, %v467_v44, %v575_v56  ;;  %v480_v2 = vadd.f32 %v1372_v19, %v479_v55  ;;  %v596_v4 = vsel %vm532_vm9, %v424_v49, %v564_v57 }
  0xee   : > { %v1014_v3 = vpack.c.bf16 %v607_v1, %v606_v58  ;;  %vm530_vm11 = vcmp.ge.f32.partialorder %v416_v61, 0.0  ;;  %v562_v5 = vmul.f32 0.2, %v416_v61  ;;  %v418_v6 = vpop.f32.mrf.mxu0  ;;  %v482_v7 = vpop.f32.mrf.mxu1  ;;  %v427_v9 = vadd.f32 %v1098_v62, %v1372_v19 }
  0xef   : > { %975 = vst [vmem:[%s1388_s17] sm:$0xff] %v974_v0   ;;  %vm546_vm12 = vcmp.ge.f32.partialorder %v480_v2, 0.0  ;;  %v578_v8 = vmul.f32 0.2, %v480_v2  ;;  %v491_v10 = vadd.f32 %v1114_v63, %v1372_v19  ;;  %v612_v11 = vsel %vm548_vm10, %v488_v50, %v580_v60 }
  0xf0   : > { %1058 = vst [vmem:[%s1388_s17 + $0x40] sm:$0xff] %v1014_v3   ;;  %v594_v12 = vsel %vm530_vm11, %v416_v61, %v562_v5  ;;  %v419_v13 = vadd.f32 %v1372_v19, %v418_v6  ;;  %v483_v14 = vadd.f32 %v1372_v19, %v482_v7  ;;  %v1101_v15 = vpop.f32.mrf.mxu0  ;;  %v1117_v16 = vpop.f32.mrf.mxu1  ;;  %vm533_vm13 = vcmp.ge.f32.partialorder %v427_v9, 0.0 }
  0xf1   : > { %v610_v17 = vsel %vm546_vm12, %v480_v2, %v578_v8  ;;  %v565_v18 = vmul.f32 0.2, %v427_v9  ;;  %vm549_vm14 = vcmp.ge.f32.partialorder %v491_v10, 0.0  ;;  %v581_v20 = vmul.f32 0.2, %v491_v10 }
  0xf2   : > { %vm531_vm15 = vcmp.ge.f32.partialorder %v419_v13, 0.0  ;;  %v563_v21 = vmul.f32 0.2, %v419_v13  ;;  %vm547_vm0 = vcmp.ge.f32.partialorder %v483_v14, 0.0  ;;  %v431_v22 = vpop.f32.mrf.mxu0  ;;  %v495_v23 = vpop.f32.mrf.mxu1  ;;  %v579_v25 = vmul.f32 0.2, %v483_v14 }
  0xf3   : > { %v597_v24 = vsel %vm533_vm13, %v427_v9, %v565_v18  ;;  %v440_v26 = vadd.f32 %v1101_v15, %v1372_v19  ;;  %v504_v27 = vadd.f32 %v1117_v16, %v1372_v19  ;;  %v613_v29 = vsel %vm549_vm14, %v491_v10, %v581_v20 }
  0xf4   : > { %v989_v28 = vpack.c.bf16 %v597_v24, %v596_v4  ;;  %v595_v30 = vsel %vm531_vm15, %v419_v13, %v563_v21  ;;  %v432_v31 = vadd.f32 %v1372_v19, %v431_v22  ;;  %v1102_v32 = vpop.f32.mrf.mxu0  ;;  %v1118_v33 = vpop.f32.mrf.mxu1  ;;  %v1029_v34 = vpack.c.bf16 %v613_v29, %v612_v11 }
  0xf5   : > { %v984_v35 = vpack.c.bf16 %v595_v30, %v594_v12  ;;  %v611_v36 = vsel %vm547_vm0, %v483_v14, %v579_v25  ;;  %vm536_vm1 = vcmp.ge.f32.partialorder %v440_v26, 0.0  ;;  %v568_v38 = vmul.f32 0.2, %v440_v26 }
  0xf6   : > { %1053 = vst [vmem:[%s1388_s17 + $0x18] sm:$0xff] %v989_v28   ;;  %v1024_v37 = vpack.c.bf16 %v611_v36, %v610_v17  ;;  %vm552_vm2 = vcmp.ge.f32.partialorder %v504_v27, 0.0  ;;  %v584_v39 = vmul.f32 0.2, %v504_v27  ;;  %v434_v40 = vpop.f32.mrf.mxu0  ;;  %v498_v41 = vpop.f32.mrf.mxu1  ;;  %1061 = vst [vmem:[%s1388_s17 + $0x58] sm:$0xff] %v1029_v34   ;;  %vm534_vm3 = vcmp.ge.f32.partialorder %v432_v31, 0.0 }
  0xf7   : > { %1052 = vst [vmem:[%s1388_s17 + $0x10] sm:$0xff] %v984_v35   ;;  %v566_v42 = vmul.f32 0.2, %v432_v31  ;;  %v496_v43 = vadd.f32 %v1372_v19, %v495_v23  ;;  %v443_v44 = vadd.f32 %v1102_v32, %v1372_v19  ;;  %v600_v45 = vsel %vm536_vm1, %v440_v26, %v568_v38 }
  0xf8   : > { %1060 = vst [vmem:[%s1388_s17 + $0x50] sm:$0xff] %v1024_v37   ;;  %v507_v46 = vadd.f32 %v1118_v33, %v1372_v19  ;;  %v435_v47 = vadd.f32 %v1372_v19, %v434_v40  ;;  %v1105_v48 = vpop.f32.mrf.mxu0  ;;  %v1121_v49 = vpop.f32.mrf.mxu1  ;;  %v616_v50 = vsel %vm552_vm2, %v504_v27, %v584_v39  ;;  %v499_v58 = vadd.f32 %v1372_v19, %v498_v41 }
  0xf9   : > { %v598_v51 = vsel %vm534_vm3, %v432_v31, %v566_v42  ;;  %vm550_vm4 = vcmp.ge.f32.partialorder %v496_v43, 0.0  ;;  %vm537_vm5 = vcmp.ge.f32.partialorder %v443_v44, 0.0  ;;  %v569_v52 = vmul.f32 0.2, %v443_v44 }
  0xfa   : > { %vm553_vm6 = vcmp.ge.f32.partialorder %v507_v46, 0.0  ;;  %v585_v53 = vmul.f32 0.2, %v507_v46  ;;  %vm535_vm7 = vcmp.ge.f32.partialorder %v435_v47, 0.0  ;;  %v447_v54 = vpop.f32.mrf.mxu0  ;;  %v511_v55 = vpop.f32.mrf.mxu1  ;;  %v582_v56 = vmul.f32 0.2, %v496_v43 }
  0xfb   : > { %v567_v57 = vmul.f32 0.2, %v435_v47  ;;  %v456_v59 = vadd.f32 %v1105_v48, %v1372_v19  ;;  %v601_v60 = vsel %vm537_vm5, %v443_v44, %v569_v52  ;;  %v520_v62 = vadd.f32 %v1121_v49, %v1372_v19 }
  0xfc   : > { %v617_v61 = vsel %vm553_vm6, %v507_v46, %v585_v53  ;;  %v448_v63 = vadd.f32 %v1372_v19, %v447_v54  ;;  %v1106_v0 = vpop.f32.mrf.mxu0  ;;  %v1122_v1 = vpop.f32.mrf.mxu1  ;;  %v999_v2 = vpack.c.bf16 %v601_v60, %v600_v45  ;;  %vm551_vm8 = vcmp.ge.f32.partialorder %v499_v58, 0.0 }
  0xfd   : > { %v1039_v3 = vpack.c.bf16 %v617_v61, %v616_v50  ;;  %v599_v4 = vsel %vm535_vm7, %v435_v47, %v567_v57  ;;  %v583_v6 = vmul.f32 0.2, %v499_v58  ;;  %v572_v7 = vmul.f32 0.2, %v456_v59 }
  0xfe   : > { %v994_v5 = vpack.c.bf16 %v599_v4, %v598_v51  ;;  %v614_v8 = vsel %vm550_vm4, %v496_v43, %v582_v56  ;;  %1055 = vst [vmem:[%s1388_s17 + $0x28] sm:$0xff] %v999_v2   ;;  %vm540_vm9 = vcmp.ge.f32.partialorder %v456_v59, 0.0  ;;  %v588_v10 = vmul.f32 0.2, %v520_v62  ;;  %v450_v13 = vpop.f32.mrf.mxu0  ;;  %v514_v14 = vpop.f32.mrf.mxu1 }
  0xff   : > { %1063 = vst [vmem:[%s1388_s17 + $0x68] sm:$0xff] %v1039_v3   ;;  %v615_v9 = vsel %vm551_vm8, %v499_v58, %v583_v6  ;;  %v512_v11 = vadd.f32 %v1372_v19, %v511_v55  ;;  %v459_v12 = vadd.f32 %v1106_v0, %v1372_v19  ;;  %vm556_vm10 = vcmp.ge.f32.partialorder %v520_v62, 0.0 }
 0x100   : > { %1054 = vst [vmem:[%s1388_s17 + $0x20] sm:$0xff] %v994_v5   ;;  %v1034_v15 = vpack.c.bf16 %v615_v9, %v614_v8  ;;  %vm538_vm11 = vcmp.ge.f32.partialorder %v448_v63, 0.0  ;;  %v523_v16 = vadd.f32 %v1122_v1, %v1372_v19  ;;  %v604_v17 = vsel %vm540_vm9, %v456_v59, %v572_v7 }
 0x101   : > { %v570_v18 = vmul.f32 0.2, %v448_v63  ;;  %vm541_vm12 = vcmp.ge.f32.partialorder %v459_v12, 0.0  ;;  %v573_v20 = vmul.f32 0.2, %v459_v12  ;;  %v451_v22 = vadd.f32 %v1372_v19, %v450_v13 }
 0x102   : > { %1062 = vst [vmem:[%s1388_s17 + $0x60] sm:$0xff] %v1034_v15   ;;  %vm557_vm13 = vcmp.ge.f32.partialorder %v523_v16, 0.0  ;;  %v589_v21 = vmul.f32 0.2, %v523_v16  ;;  %v515_v23 = vadd.f32 %v1372_v19, %v514_v14  ;;  %v620_v24 = vsel %vm556_vm10, %v520_v62, %v588_v10 }
 0x103   : > { %vm554_vm14 = vcmp.ge.f32.partialorder %v512_v11, 0.0  ;;  %v586_v25 = vmul.f32 0.2, %v512_v11  ;;  %v605_v26 = vsel %vm541_vm12, %v459_v12, %v573_v20  ;;  %vm539_vm15 = vcmp.ge.f32.partialorder %v451_v22, 0.0 }
 0x104   : > { %v1009_v27 = vpack.c.bf16 %v605_v26, %v604_v17  ;;  %v621_v28 = vsel %vm557_vm13, %v523_v16, %v589_v21  ;;  %v571_v29 = vmul.f32 0.2, %v451_v22  ;;  %vm555_vm0 = vcmp.ge.f32.partialorder %v515_v23, 0.0 }
 0x105   : > { %v1049_v30 = vpack.c.bf16 %v621_v28, %v620_v24  ;;  %v587_v31 = vmul.f32 0.2, %v515_v23  ;;  %v602_v19 = vsel %vm538_vm11, %v448_v63, %v570_v18  ;;  %v618_v33 = vsel %vm554_vm14, %v512_v11, %v586_v25 }
 0x106   : > { %1057 = vst [vmem:[%s1388_s17 + $0x38] sm:$0xff] %v1009_v27   ;;  %v603_v32 = vsel %vm539_vm15, %v451_v22, %v571_v29 }
 0x107   : > { %1065 = vst [vmem:[%s1388_s17 + $0x78] sm:$0xff] %v1049_v30   ;;  %v1004_v34 = vpack.c.bf16 %v603_v32, %v602_v19  ;;  %v619_v35 = vsel %vm555_vm0, %v515_v23, %v587_v31 }
 0x108   : > { %v1044_v36 = vpack.c.bf16 %v619_v35, %v618_v33 }
 0x109   : > { %1056 = vst [vmem:[%s1388_s17 + $0x30] sm:$0xff] %v1004_v34  }
 0x10a   : > { %1064 = vst [vmem:[%s1388_s17 + $0x70] sm:$0xff] %v1044_v36  }
 0x10b   : > { %1202 = shalt.err (!%p1199_p3)
}
 0x10c   : > { %s1203_s4 = scalar_lea.hbm %s1435_s26, 2048  ;;  %s1207_s7 = scalar_lea.hbm %s1486_s3, 4096 }
 0x10d   : > { %p1204_p4 = scmp.ne.s32.totalorder %s1435_s26, %s1203_s4  ;;  %p1208_p9 = scmp.lt.s32.totalorder %s1435_s26, %s1486_s3 }
 0x10e   : > { %p1209_p10 = scmp.lt.s32.totalorder %s1207_s7, %s1203_s4 }
 0x10f   : > { %p1205_p7 = pnand %p1204_p4, %p1312_p5 }
 0x110   : > { %p1210_p11 = por %p1209_p10, %p1208_p9 }
 0x111   : > { %p1206_p8 = pneg %p1205_p7 }
 0x113   : > { %p1211_p12 = pnand %p1210_p11, %p1206_p8 }
 0x115   : > { %1214 = shalt.err (!%p1211_p12)
}
 0x116   : > { %s1252_s10 = smov 64   ;;  %s1253_s11 = smov 4  }
 0x117   : > { %1129 = dma.vmem_to_hbm [thread:$0]  (%p1312_p5), %s1437_s20, 2048, %s1435_s26, %s1443_s16, %s1252_s10, %s1252_s10, %s1253_s11  }
 0x118 PF: > { %p1135_p13 = scmp.ge.s32.totalorder %s1249_s15, 2  ;;  %s811_s17 = sand.u32 1, %s1237_s12  }
 0x119   : > { %s812_s19 = scalar_lea.sflag [#allocation3], %s811_s17 }
 0x11a   : > { %p1132_p0 = pnand %p1135_p13, %p1316_p6 }
 0x11c   : > { %p1133_p1 = pneg %p1132_p0 }
 0x11e   : > { %1232 = dma.done.wait (%p1133_p1), %s812_s19, 2048  }
 0x11f   : > { %1234 = vsyncadd (%p1133_p1), %s812_s19, 4294965248  ;;  %p13_p2 = scmp.ge.s32.totalorder %s1299_s18, 4   ;;  %s1489_s12 = smov %s1241_s13 }
 0x120   : > { %s1490_s13 = smov %s1245_s14  ;;  %s1491_s14 = smov %s1310_s21 }
 0x121   : > { %s1492_s15 = smov %s1299_s18  ;;  %15 = sbr.rel (!%p13_p2) target bundleno = 3 (0x3), region = 67 }
 0x126   :  { %817 = vsyncpa [#allocation3], 1 }
 0x127   :  { %819 = vsyncpa [#allocation3 + $0x1], 1 }

</bundles_post_ra>
